<compile_context>
chip_gen: v7x
topology: tpu7x:2x2x1
jax: 0.10.0
libtpu: 0.0.40
codegen_flags: <defaults>
</compile_context>

<pallas_src>
import functools

import jax
import jax.numpy as jnp
from jax.experimental import pallas as pl
from jax.experimental.pallas import tpu as pltpu

_MIB = 1024 * 1024


# ---------------------------------------------------------------------------
# Helpers
# ---------------------------------------------------------------------------

def _round_up(a, m):
    return ((a + m - 1) // m) * m


def _min_sublane_tile(dtype):
    # Native sublane packing: f32 -> 8 rows/vreg, bf16 -> 16, int8/fp8 -> 32.
    itemsize = jnp.dtype(dtype).itemsize
    return max(8, 32 // max(1, itemsize))


@functools.lru_cache(maxsize=1)
def _tpu_vmem_capacity_bytes():
    try:
        info = pltpu.get_tpu_info()
        cap = int(getattr(info, "vmem_capacity_bytes", 0) or 0)
        if cap > 0:
            return cap
    except Exception:
        pass
    return 64 * _MIB  # conservative (v7x-sized) fallback


def _gen_params():
    """Generation-aware knobs derived from VMEM capacity."""
    cap = _tpu_vmem_capacity_bytes()
    vmem_budget = int(cap * 3 // 4)        # ~48 MiB on v7x, ~96 MiB on v5e/v6e
    if cap <= 64 * _MIB:                   # v7x-class: 64 MiB VMEM, ~3.2 TB/s HBM, 2 TCs
        target_block_bytes = 6 * _MIB
        two_core_hint = True
    else:                                  # v5e / v6e: 128 MiB VMEM, single TensorCore
        target_block_bytes = 2 * _MIB
        two_core_hint = False
    return vmem_budget, target_block_bytes, two_core_hint


# ---------------------------------------------------------------------------
# Kernels
# ---------------------------------------------------------------------------

def _rmsnorm_fused_kernel(x_ref, scale_ref, o_ref, *, eps, inv_n):
    # x_ref: (TB, N), scale_ref: (1, N) native dtype, o_ref: (TB, N)
    xf = x_ref[...].astype(jnp.float32)
    ssq = jnp.sum(xf * xf, axis=-1, keepdims=True)              # (TB, 1) f32 accumulation
    inv_rms = jax.lax.rsqrt(ssq * inv_n + eps)                    # (TB, 1)
    o_ref[...] = (xf * inv_rms * scale_ref[...].astype(jnp.float32)).astype(o_ref.dtype)


def _sumsq_kernel(x_ref, ssq_ref, *, n_valid, chunk):
    # Accumulate per-row sum of squares across the chunk (k) grid axis.
    @pl.when(pl.program_id(1) == 0)
    def _init():
        ssq_ref[...] = jnp.zeros_like(ssq_ref)

    xf = x_ref[...].astype(jnp.float32)                           # (TB, C)
    if n_valid % chunk != 0:
        # Ragged last chunk: Pallas does not zero-fill OOB lanes of an edge block, so mask.
        k = pl.program_id(1)
        col = jax.lax.broadcasted_iota(jnp.int32, xf.shape, 1) + k * chunk
        xf = jnp.where(col < n_valid, xf, 0.0)
    ssq_ref[...] += jnp.sum(xf * xf, axis=-1, keepdims=True)      # (TB, 1)


def _normalize_kernel(ssq_ref, x_ref, scale_ref, o_ref, *, eps, inv_n):
    inv_rms = jax.lax.rsqrt(ssq_ref[...] * inv_n + eps)           # (TB, 1)
    o_ref[...] = (x_ref[...].astype(jnp.float32) * inv_rms
                  * scale_ref[...].astype(jnp.float32)).astype(o_ref.dtype)


# ---------------------------------------------------------------------------
# Wrappers
# ---------------------------------------------------------------------------

def _rmsnorm_flat_fused(x2, scale2, eps, n_elems, *, TB, vmem_bytes):
    """Single-pass path: whole row (S*D) resident per block, TB rows per grid step."""
    B, N = x2.shape
    kernel = functools.partial(_rmsnorm_fused_kernel, eps=eps, inv_n=1.0 / n_elems)
    return pl.pallas_call(
        kernel,
        out_shape=jax.ShapeDtypeStruct((B, N), x2.dtype),
        grid_spec=pltpu.PrefetchScalarGridSpec(
            num_scalar_prefetch=0,
            grid=(pl.cdiv(B, TB),),
            in_specs=[
                pl.BlockSpec((TB, N), lambda b: (b, 0)),
                pl.BlockSpec((1, N), lambda b: (0, 0)),   # scale: VMEM-resident (constant index)
            ],
            out_specs=pl.BlockSpec((TB, N), lambda b: (b, 0)),
        ),
        compiler_params=pltpu.CompilerParams(
            dimension_semantics=("parallel",),
            vmem_limit_bytes=int(vmem_bytes),
        ),
    )(x2, scale2)


def _rmsnorm_flat_chunked(x2, scale2, eps, n_elems, *, target_block_bytes, vmem_budget):
    """Two-pass path for rows too large to keep whole in VMEM:
    pass 1 accumulates sum-of-squares per row over chunks, pass 2 normalizes."""
    B, N = x2.shape
    isz = x2.dtype.itemsize
    ssz = scale2.dtype.itemsize

    min_tb = _min_sublane_tile(x2.dtype)
    TB = B if B <= min_tb else min_tb
    nb = pl.cdiv(B, TB)

    # Pick C so it (nearly) divides N, 128-lane aligned; ragged tail is masked in-kernel.
    lane_chunk = max(128, (target_block_bytes // max(1, TB * isz)) // 128 * 128)
    nk = max(1, pl.cdiv(N, lane_chunk))
    C = min(_round_up(pl.cdiv(N, nk), 128), _round_up(N, 128))
    nk = pl.cdiv(N, C)

    blk = TB * C * isz
    vmem1 = int(min(vmem_budget, max(16 * _MIB, 2 * blk + 2 * TB * C * 4 + 2 * _MIB)))
    vmem2 = int(min(vmem_budget, max(16 * _MIB,
                                     4 * blk + 2 * TB * C * 4 + 2 * C * ssz + 2 * _MIB)))

    # Pass 1: per-row sum of squares over chunks (masked ragged tail).
    ssq = pl.pallas_call(
        functools.partial(_sumsq_kernel, n_valid=N, chunk=C),
        out_shape=jax.ShapeDtypeStruct((B, 1), jnp.float32),
        grid_spec=pltpu.PrefetchScalarGridSpec(
            num_scalar_prefetch=0,
            grid=(nb, nk),
            in_specs=[pl.BlockSpec((TB, C), lambda b, k: (b, k))],
            out_specs=pl.BlockSpec((TB, 1), lambda b, k: (b, 0)),
        ),
        compiler_params=pltpu.CompilerParams(
            dimension_semantics=("parallel", "arbitrary"),
            vmem_limit_bytes=vmem1,
        ),
    )(x2)

    # Pass 2: stream x again and normalize. Grid is (k outer, b inner) so each native-dtype
    # scale chunk is fetched once per k (not once per grid step).
    kernel2 = functools.partial(_normalize_kernel, eps=eps, inv_n=1.0 / n_elems)
    out = pl.pallas_call(
        kernel2,
        out_shape=jax.ShapeDtypeStruct((B, N), x2.dtype),
        grid_spec=pltpu.PrefetchScalarGridSpec(
            num_scalar_prefetch=0,
            grid=(nk, nb),
            in_specs=[
                pl.BlockSpec((TB, 1), lambda k, b: (b, 0)),
                pl.BlockSpec((TB, C), lambda k, b: (b, k)),
                pl.BlockSpec((1, C), lambda k, b: (0, k)),
            ],
            out_specs=pl.BlockSpec((TB, C), lambda k, b: (b, k)),
        ),
        compiler_params=pltpu.CompilerParams(
            dimension_semantics=("parallel", "parallel"),
            vmem_limit_bytes=vmem2,
        ),
    )(ssq, x2, scale2)
    return out


def rmsnorm(x, scale, eps=1e-8, *, force_chunked=False, target_block_bytes=None):
    """x: [B, S, D], scale: [S, D]. Returns scale * x / rms(x, dims=(-2,-1))."""
    B, S, D = x.shape
    assert scale.shape == (S, D)
    N = S * D

    # Lane-dense flatten of the normalized dims (contiguous reshape: free).
    x2 = x.reshape(B, N)
    scale2 = scale.reshape(1, N)          # native dtype; cast in-kernel (hidden under DMA)

    vmem_budget, gen_target, two_core_hint = _gen_params()
    if target_block_bytes is None:
        target_block_bytes = gen_target

    isz = x2.dtype.itemsize
    ssz = scale2.dtype.itemsize
    min_tb = _min_sublane_tile(x2.dtype)
    row_bytes = N * isz

    # Double-buffered fused footprint per batch row (+ f32 intermediate headroom) and fixed
    # scale cost. Used both for dispatch (VMEM-budget based) and for capping TB.
    per_row = N * (2 * isz + 2 * isz + 2 * 4)
    fixed = 2 * N * ssz

    def fused_bytes(tb):
        return tb * per_row + fixed + _MIB

    if (not force_chunked) and fused_bytes(min_tb) <= vmem_budget:
        # --- single-pass fused path ---
        tb = max(min_tb, (target_block_bytes // max(1, row_bytes)) // min_tb * min_tb)
        tb_budget = max(min_tb,
                        ((vmem_budget - fixed - _MIB) // per_row) // min_tb * min_tb)
        tb = min(tb, tb_budget)
        if tb >= B:
            tb = B                         # full batch dim is always a legal block size
        if two_core_hint and tb >= B and B > min_tb:
            # Keep >= 2 grid steps so both v7x TensorCores get work.
            tb = max(min_tb, _round_up(pl.cdiv(B, 2), min_tb))
        vmem = int(min(vmem_budget, max(16 * _MIB, fused_bytes(tb) + 4 * _MIB)))
        out2 = _rmsnorm_flat_fused(x2, scale2, eps, N, TB=tb, vmem_bytes=vmem)
    else:
        out2 = _rmsnorm_flat_chunked(x2, scale2, eps, N,
                                     target_block_bytes=target_block_bytes,
                                     vmem_budget=vmem_budget)
    return out2.reshape(B, S, D)


def rmsnorm_ref(x, scale, eps=1e-8):
    xf = x.astype(jnp.float32)
    rms = jnp.sqrt(jnp.mean(xf * xf, axis=(-2, -1), keepdims=True) + eps)
    return (scale.astype(jnp.float32) * xf / rms).astype(x.dtype)


# TODO(synk): the surrounding Model (ResBlock stacks, LSTM, STAR's torch.multinomial sampling,
# final projection) is not ported here; this kernel covers the RMSNorm building block.

if __name__ == "__main__":
    k0, k1, k2 = jax.random.split(jax.random.PRNGKey(0), 3)

    # 1) Base case (fused path): shapes consistent with RMSNorm([enc_in, seq_len]).
    B, S, D = 2, 8, 32
    x = jax.random.normal(k0, (B, S, D), dtype=jnp.float32)
    scale = jnp.ones((S, D), dtype=jnp.float32)     # nn.Parameter(torch.ones(*shape))
    out = jax.block_until_ready(rmsnorm(x, scale))
    assert out.shape == (B, S, D)
    assert jnp.allclose(out, rmsnorm_ref(x, scale), atol=1e-5, rtol=1e-5)

    # 2) Ragged batch on the fused path (grid = cdiv(B, TB); no jnp.pad / output slice).
    B2, S2, D2 = 10, 8, 24                           # N = 192 (not a multiple of 128)
    x_r = jax.random.normal(k1, (B2, S2, D2), dtype=jnp.float32)
    scale_r = 1.0 + 0.1 * jax.random.normal(k2, (S2, D2), dtype=jnp.float32)
    ref_r = rmsnorm_ref(x_r, scale_r)
    out_r = jax.block_until_ready(rmsnorm(x_r, scale_r, target_block_bytes=1))
    assert jnp.allclose(out_r, ref_r, atol=1e-5, rtol=1e-5)

    # 3) Two-pass chunked path with ragged batch AND masked ragged lane chunk.
    out_c = jax.block_until_ready(
        rmsnorm(x_r, scale_r, force_chunked=True, target_block_bytes=1))
    assert jnp.allclose(out_c, ref_r, atol=1e-5, rtol=1e-5)

    # 4) bf16 activations (sublane-aligned TB, in-kernel f32 accumulation).
    xb = x_r.astype(jnp.bfloat16)
    sb = scale_r.astype(jnp.bfloat16)
    out_b = jax.block_until_ready(rmsnorm(xb, sb))
    assert jnp.allclose(out_b.astype(jnp.float32),
                        rmsnorm_ref(xb, sb).astype(jnp.float32),
                        atol=5e-2, rtol=5e-2)

    print("KERNEL_OK")
</pallas_src>

<mosaic_0001>
module attributes {stable_mosaic.version = 11 : i64} {
  func.func @_rmsnorm_fused_kernel(%arg0: i32, %arg1: memref<2x256xf32, #tpu.memory_space<vmem>>, %arg2: memref<1x256xf32, #tpu.memory_space<vmem>>, %arg3: memref<2x256xf32, #tpu.memory_space<vmem>>) attributes {dimension_semantics = [#tpu.dimension_semantics<parallel>], iteration_bounds = array<i64: 1>, scalar_prefetch = 0 : i64, scratch_operands = 0 : i64, tpu.core_type = #tpu.core_type<tc>, window_params = [{transform_indices = @transform_0, window_bounds = array<i64: 2, 256>}, {pipeline_mode = #tpu.pipeline_mode<synchronous>, transform_indices = @transform_1, window_bounds = array<i64: 1, 256>}, {transform_indices = @transform_2, window_bounds = array<i64: 2, 256>}]} {
    %c0 = arith.constant 0 : index
    %c0_0 = arith.constant 0 : index
    %0 = vector.load %arg1[%c0, %c0_0] : memref<2x256xf32, #tpu.memory_space<vmem>>, vector<2x256xf32>
    %1 = arith.mulf %0, %0 : vector<2x256xf32>
    %cst = arith.constant dense<0.000000e+00> : vector<2xf32>
    %2 = vector.multi_reduction <add>, %1, %cst [1] : vector<2x256xf32> to vector<2xf32>
    %3 = vector.shape_cast %2 : vector<2xf32> to vector<2x1xf32>
    %cst_1 = arith.constant 3.906250e-03 : f32
    %4 = vector.broadcast %cst_1 : f32 to vector<2x1xf32>
    %5 = arith.mulf %3, %4 : vector<2x1xf32>
    %cst_2 = arith.constant 9.99999993E-9 : f32
    %6 = vector.broadcast %cst_2 : f32 to vector<2x1xf32>
    %7 = arith.addf %5, %6 : vector<2x1xf32>
    %8 = math.rsqrt %7 : vector<2x1xf32>
    %9 = vector.broadcast %8 : vector<2x1xf32> to vector<2x256xf32>
    %10 = arith.mulf %0, %9 : vector<2x256xf32>
    %c0_3 = arith.constant 0 : index
    %c0_4 = arith.constant 0 : index
    %11 = vector.load %arg2[%c0_3, %c0_4] : memref<1x256xf32, #tpu.memory_space<vmem>>, vector<1x256xf32>
    %12 = vector.broadcast %11 : vector<1x256xf32> to vector<2x256xf32>
    %13 = arith.mulf %10, %12 : vector<2x256xf32>
    %c0_5 = arith.constant 0 : index
    %c0_6 = arith.constant 0 : index
    %14 = vector.load %arg3[%c0_5, %c0_6] : memref<2x256xf32, #tpu.memory_space<vmem>>, vector<2x256xf32>
    tpu.vector_store %arg3[%c0_5, %c0_6], %13 {strides = array<i32>} : memref<2x256xf32, #tpu.memory_space<vmem>>, vector<2x256xf32>,
    return
  }
  func.func @transform_0(%arg0: i32) -> (i32, i32) {
    %c0_i32 = arith.constant 0 : i32
    %c0_i32_0 = arith.constant 0 : i32
    return %arg0, %c0_i32 : i32, i32
  }
  func.func @transform_1(%arg0: i32) -> (i32, i32) {
    %c0_i32 = arith.constant 0 : i32
    %c0_i32_0 = arith.constant 0 : i32
    %c0_i32_1 = arith.constant 0 : i32
    return %c0_i32, %c0_i32_0 : i32, i32
  }
  func.func @transform_2(%arg0: i32) -> (i32, i32) {
    %c0_i32 = arith.constant 0 : i32
    %c0_i32_0 = arith.constant 0 : i32
    return %arg0, %c0_i32 : i32, i32
  }
}

</mosaic_0001>

<bundles_post_ra>
// kernel: tpu_custom_call.1
= control target key start
LH: loop header
LB: loop body
LE: loop exit
PB: predicated region body
PF: predicated region fallthrough
CT: control target
= control target key end

     0   :  { %7 = vsyncpa [#allocation3], 0  ;;  %s192_s0 = inlined_call_operand.hbm [shape: f32[2,256], index: 0, kind: input, shape index: {}]   ;;  %s193_s1 = inlined_call_operand.vmem [shape: f32[1,256], index: 1, kind: input, shape index: {}]   ;;  %s194_s2 = inlined_call_operand.hbm [shape: f32[2,256], index: 2, kind: output, shape index: {}]  }
   0x1   :  { %8 = vsyncpa [#allocation4], 0  ;;  %s146_s9 = smov [#allocation2]   ;;  %s98_s13 = scalar_lea.hbm %s192_s0, 64 }
   0x2   :  { %s15_s10 = sshll.u32 %s146_s9, 4  ;;  %p99_p0 = scmp.ne.s32.totalorder %s192_s0, %s98_s13  ;;  %s16_s10 = int_to_ptr.vmem [resolvable:$true] %s15_s10 }
   0x3   :  { %p102_p1 = scmp.lt.u32.totalorder %s98_s13, %s192_s0 }
   0x5   :  { %p104_p2 = pnand %p102_p1, %p99_p0 }
   0x7   :  { %107 = shalt.err (!%p104_p2)
}
   0x8   :  { %s108_s18 = scalar_lea.vmem %s16_s10, 64  ;;  %p113_p4 = scmp.lt.s32.totalorder %s16_s10, %s16_s10 }
   0x9   :  { %p109_p3 = scmp.ne.s32.totalorder %s16_s10, %s108_s18  ;;  %p114_p5 = scmp.lt.s32.totalorder %s108_s18, %s108_s18 }
   0xb   :  { %p115_p6 = por %p114_p5, %p113_p4 }
   0xd   :  { %p116_p7 = pnand %p115_p6, %p109_p3 }
   0xf   :  { %119 = shalt.err (!%p116_p7)
}
  0x10   :  { %18 = dma.hbm_to_vmem [thread:$0]  %s192_s0, 64, %s16_s10, [#allocation3]  }
  0x11   :  { %142 = dma.done.wait [#allocation3], 64  }
  0x12   :  { %143 = vsyncadd [#allocation3], 4294967232  ;;  %v30_v0 = vlaneseq  ;;  %v147_v1 = vmov 1983009808   ;;  %v24_v6 = vld [vmem:[#allocation2] sm:$0xf] }
  0x13   :  { %v28_v2 = vunpack.c.l.s4 %v147_v1  ;;  %v25_v7 = vmul.f32 %v24_v6, %v24_v6  ;;  %vm37_vm0 = vcmask 1041408   ;;  %v56_v15 = vld [vmem:[%s193_s1] sm:$0x3]  ;;  %v148_v23 = vmov 269488144   ;;  %s149_s22 = smov [#allocation5]  }
  0x14   :  { %v31_v3 = vshrl.u32 %v30_v0, 7  ;;  %v48_v24 = vunpack.c.l.s4 %v148_v23  ;;  %s83_s23 = sshll.u32 %s149_s22, 4  ;;  %s84_s23 = int_to_ptr.vmem [resolvable:$true] %s83_s23 }
  0x15   :  { %v29_v4 = vunpack.c.0.s8 %v28_v2  ;;  %s120_s1 = scalar_lea.vmem %s84_s23, 64  ;;  %p125_p9 = scmp.lt.s32.totalorder %s84_s23, %s84_s23 }
  0x16   :  { %v60_v13 = vsub.s32 0, %v31_v3  ;;  %v64_v14 = vsub.s32 1, %v31_v3  ;;  %v49_v25 = vunpack.c.0.s8 %v48_v24  ;;  %p121_p8 = scmp.ne.s32.totalorder %s84_s23, %s120_s1  ;;  %p126_p10 = scmp.lt.s32.totalorder %s120_s1, %s120_s1 }
  0x17   :  { %v32_v5 = vsub.s32 %v29_v4, %v31_v3 }
  0x18   :  { %v61_v16 = vrot.slane %v56_v15, %v60_v13  ;;  %v65_v17 = vrot.slane %v56_v15, %v64_v14  ;;  %v52_v26 = vsub.s32 %v49_v25, %v31_v3  ;;  %p127_p11 = por %p126_p10, %p125_p9 }
  0x19   :  { %v33_v8 = vrot.slane %v25_v7, %v32_v5 }
  0x1a   :  { %v66_v18 = vcombine.low %v61_v16, %v65_v17  ;;  %p128_p12 = pnand %p127_p11, %p121_p8 }
  0x1b   :  { %v34_v9 = vcombine.high %v33_v8, %v33_v8  ;;  %v38_v10 = vsel %vm37_vm0, %v33_v8, 0.0 }
  0x1c   :  { %v73_v19 = vrot.slane %v66_v18, %v32_v5 }
  0x1d   :  { %v39_v11 = vsel %vm37_vm0, %v34_v9, 0.0 }
  0x1e   :  { %v40_v12 = vadd.f32 %v39_v11, %v38_v10 }
  0x20   :  { %41 = vadd.xlane.f32.xlu0 %v40_v12 }
  0xad   :  { %v42_v20 = vpop.xlane.xlu0 %41 }
  0xae   :  { %v43_v21 = vmul.f32 0.00390625, %v42_v20 }
  0xb0   :  { %v44_v22 = vadd.f32 1e-08, %v43_v21 }
  0xb2   :  { %96 = vrsqrt.f32 %v44_v22 }
  0xbc   :  { %v97_v27 = vpop.eup %96 }
  0xbd   :  { %v53_v28 = vrot.slane %v97_v27, %v52_v26 }
  0xbf   :  { %v55_v29 = vmul.f32 %v53_v28, %v24_v6 }
  0xc1   :  { %v75_v30 = vmul.f32 %v73_v19, %v55_v29 }
  0xc3   :  { %76 = vst [vmem:[#allocation5] sm:$0xf] %v75_v30 }
  0xc4   :  { %131 = shalt.err (!%p128_p12)
}
  0xc5   :  { %s132_s26 = scalar_lea.hbm %s194_s2, 64 }
  0xc6   :  { %p133_p13 = scmp.ne.s32.totalorder %s194_s2, %s132_s26  ;;  %p136_p0 = scmp.lt.u32.totalorder %s132_s26, %s194_s2 }
  0xc8   :  { %p138_p1 = pnand %p136_p0, %p133_p13 }
  0xca   :  { %141 = shalt.err (!%p138_p1)
}
  0xcb   :  { %86 = dma.vmem_to_hbm [thread:$0]  %s84_s23, 64, %s194_s2, [#allocation4]  }
  0xcc   :  { %144 = dma.done.wait [#allocation4], 64  }
  0xcd   :  { %145 = vsyncadd [#allocation4], 4294967232 }
  0xce   :  { %90 = vsyncpa [#allocation3], 1 }
  0xcf   :  { %91 = vsyncpa [#allocation4], 1 }

</bundles_post_ra>
